<compile_context>
chip_gen: v7x
topology: tpu7x:2x2x1
jax: 0.10.0
libtpu: 0.0.40
codegen_flags: <defaults>
</compile_context>

<pallas_src>
import jax
import jax.numpy as jnp
import numpy as np
from jax.experimental import pallas as pl
from jax.experimental.pallas import tpu as pltpu


def _concat_kernel(*refs):
    """refs = (*in_refs, o_ref); in_ref_i: (1, C_i, T), o_ref: (1, C_total, T)."""
    *in_refs, o_ref = refs
    off = 0
    for r in in_refs:
        c = r.shape[1]
        # Static channel slice; T (lane axis) is copied whole -> unmasked,
        # lane-dense stores.
        o_ref[:, off:off + c, :] = r[...]
        off += c


def concat(xs, dimension=1):
    """Pallas TPU equivalent of torch.cat(xs, dim=dimension)."""
    xs = list(xs)
    rank = xs[0].ndim
    d = dimension % rank

    lead_shape = xs[0].shape[:d]
    trail_shape = xs[0].shape[d + 1:]
    L = int(np.prod(lead_shape, dtype=np.int64)) if lead_shape else 1
    T = int(np.prod(trail_shape, dtype=np.int64)) if trail_shape else 1
    cs = [int(x.shape[d]) for x in xs]
    c_total = sum(cs)
    dtype = xs[0].dtype

    # Normalize every input to (L, C_i, T): concat axis is always axis 1 and
    # the trailing (lane) axis is as wide as possible (H*W for NCHW, dim=1).
    xs3 = [x.reshape(L, c, T) for x, c in zip(xs, cs)]

    out = pl.pallas_call(
        _concat_kernel,
        out_shape=jax.ShapeDtypeStruct((L, c_total, T), dtype),
        grid_spec=pltpu.PrefetchScalarGridSpec(
            num_scalar_prefetch=0,
            grid=(L,),
            in_specs=[
                pl.BlockSpec((1, c, T), lambda l: (l, 0, 0)) for c in cs
            ],
            out_specs=pl.BlockSpec((1, c_total, T), lambda l: (l, 0, 0)),
        ),
        compiler_params=pltpu.CompilerParams(
            dimension_semantics=("parallel",)),
    )(*xs3)

    return out.reshape(*lead_shape, c_total, *trail_shape)


if __name__ == "__main__":
    key = jax.random.PRNGKey(0)
    k1, k2, k3 = jax.random.split(key, 3)

    # Small NCHW feature maps, concatenated along channels (YOLO-style).
    N, H, W = 2, 16, 16
    x1 = jax.random.normal(k1, (N, 4, H, W), dtype=jnp.float32)
    x2 = jax.random.normal(k2, (N, 4, H, W), dtype=jnp.float32)
    x3 = jax.random.normal(k3, (N, 8, H, W), dtype=jnp.float32)
    xs = [x1, x2, x3]

    out = concat(xs, dimension=1)
    out = jax.block_until_ready(out)

    ref = jax.block_until_ready(jnp.concatenate(xs, axis=1))
    np.testing.assert_array_equal(np.asarray(out), np.asarray(ref))

    print("KERNEL_OK")
</pallas_src>

<mosaic_0001>
module attributes {stable_mosaic.version = 11 : i64} {
  func.func @_concat_kernel(%arg0: i32, %arg1: memref<1x4x256xf32, #tpu.memory_space<vmem>>, %arg2: memref<1x4x256xf32, #tpu.memory_space<vmem>>, %arg3: memref<1x8x256xf32, #tpu.memory_space<vmem>>, %arg4: memref<1x16x256xf32, #tpu.memory_space<vmem>>) attributes {dimension_semantics = [#tpu.dimension_semantics<parallel>], iteration_bounds = array<i64: 2>, scalar_prefetch = 0 : i64, scratch_operands = 0 : i64, tpu.core_type = #tpu.core_type<tc>, window_params = [{transform_indices = @transform_0, window_bounds = array<i64: 1, 4, 256>}, {transform_indices = @transform_1, window_bounds = array<i64: 1, 4, 256>}, {transform_indices = @transform_2, window_bounds = array<i64: 1, 8, 256>}, {transform_indices = @transform_3, window_bounds = array<i64: 1, 16, 256>}]} {
    %c0 = arith.constant 0 : index
    %c0_0 = arith.constant 0 : index
    %c0_1 = arith.constant 0 : index
    %0 = vector.load %arg1[%c0, %c0_0, %c0_1] : memref<1x4x256xf32, #tpu.memory_space<vmem>>, vector<1x4x256xf32>
    %c0_2 = arith.constant 0 : index
    %c0_3 = arith.constant 0 : index
    %c0_4 = arith.constant 0 : index
    %1 = vector.load %arg4[%c0_2, %c0_3, %c0_4] : memref<1x16x256xf32, #tpu.memory_space<vmem>>, vector<1x4x256xf32>
    tpu.vector_store %arg4[%c0_2, %c0_3, %c0_4], %0 {strides = array<i32>} : memref<1x16x256xf32, #tpu.memory_space<vmem>>, vector<1x4x256xf32>,
    %c0_5 = arith.constant 0 : index
    %c0_6 = arith.constant 0 : index
    %c0_7 = arith.constant 0 : index
    %2 = vector.load %arg2[%c0_5, %c0_6, %c0_7] : memref<1x4x256xf32, #tpu.memory_space<vmem>>, vector<1x4x256xf32>
    %c0_8 = arith.constant 0 : index
    %c4 = arith.constant 4 : index
    %c0_9 = arith.constant 0 : index
    %3 = vector.load %arg4[%c0_8, %c4, %c0_9] : memref<1x16x256xf32, #tpu.memory_space<vmem>>, vector<1x4x256xf32>
    tpu.vector_store %arg4[%c0_8, %c4, %c0_9], %2 {strides = array<i32>} : memref<1x16x256xf32, #tpu.memory_space<vmem>>, vector<1x4x256xf32>,
    %c0_10 = arith.constant 0 : index
    %c0_11 = arith.constant 0 : index
    %c0_12 = arith.constant 0 : index
    %4 = vector.load %arg3[%c0_10, %c0_11, %c0_12] : memref<1x8x256xf32, #tpu.memory_space<vmem>>, vector<1x8x256xf32>
    %c0_13 = arith.constant 0 : index
    %c8 = arith.constant 8 : index
    %c0_14 = arith.constant 0 : index
    %5 = vector.load %arg4[%c0_13, %c8, %c0_14] : memref<1x16x256xf32, #tpu.memory_space<vmem>>, vector<1x8x256xf32>
    tpu.vector_store %arg4[%c0_13, %c8, %c0_14], %4 {strides = array<i32>} : memref<1x16x256xf32, #tpu.memory_space<vmem>>, vector<1x8x256xf32>,
    return
  }
  func.func @transform_0(%arg0: i32) -> (i32, i32, i32) {
    %c0_i32 = arith.constant 0 : i32
    %c0_i32_0 = arith.constant 0 : i32
    %c0_i32_1 = arith.constant 0 : i32
    return %arg0, %c0_i32, %c0_i32_0 : i32, i32, i32
  }
  func.func @transform_1(%arg0: i32) -> (i32, i32, i32) {
    %c0_i32 = arith.constant 0 : i32
    %c0_i32_0 = arith.constant 0 : i32
    %c0_i32_1 = arith.constant 0 : i32
    return %arg0, %c0_i32, %c0_i32_0 : i32, i32, i32
  }
  func.func @transform_2(%arg0: i32) -> (i32, i32, i32) {
    %c0_i32 = arith.constant 0 : i32
    %c0_i32_0 = arith.constant 0 : i32
    %c0_i32_1 = arith.constant 0 : i32
    return %arg0, %c0_i32, %c0_i32_0 : i32, i32, i32
  }
  func.func @transform_3(%arg0: i32) -> (i32, i32, i32) {
    %c0_i32 = arith.constant 0 : i32
    %c0_i32_0 = arith.constant 0 : i32
    %c0_i32_1 = arith.constant 0 : i32
    return %arg0, %c0_i32, %c0_i32_0 : i32, i32, i32
  }
}

</mosaic_0001>

<bundles_post_ra>
// kernel: tpu_custom_call.1
= control target key start
LH: loop header
LB: loop body
LE: loop exit
PB: predicated region body
PF: predicated region fallthrough
CT: control target
= control target key end

     0   :  { %8 = vsyncpa [#allocation3], 0  ;;  %s921_s0 = inlined_call_operand.hbm [shape: f32[2,4,256], index: 0, kind: input, shape index: {}]   ;;  %s922_s1 = inlined_call_operand.hbm [shape: f32[2,4,256], index: 1, kind: input, shape index: {}]   ;;  %s923_s2 = inlined_call_operand.hbm [shape: f32[2,8,256], index: 2, kind: input, shape index: {}]   ;;  %s924_s3 = inlined_call_operand.hbm [shape: f32[2,16,256], index: 3, kind: output, shape index: {}]  }
   0x1   :  { %10 = vsyncpa [#allocation3 + $0x1], 0 }
   0x2   :  { %11 = vsyncpa [#allocation6], 0 }
   0x3   :  { %13 = vsyncpa [#allocation6 + $0x1], 0 }
   0x4   :  { %14 = vsyncpa [#allocation4], 0 }
   0x5   :  { %16 = vsyncpa [#allocation4 + $0x1], 0  ;;  %s680_s12 = smov 0   ;;  %s682_s13 = smov 0  }
   0x6   :  { %s684_s14 = smov 0   ;;  %s686_s15 = smov 0  }
   0x7 LB: > { %s701_s16 = sadd.s32 4294967295, %s652_s15   ;;  %s406_s17 = sadd.s32 4294967294, %s652_s15   ;;  %s652_s15 = sphi %s686_s15, %s944_s15   ;;  %s648_s14 = sphi %s684_s14, %s943_s14   ;;  %s644_s13 = sphi %s682_s13, %s942_s13   ;;  %s640_s12 = sphi %s680_s12, %s941_s12  }
   0x8   : > { %s705_s18 = sadd.s32 1, %s652_s15   ;;  %s29_s19 = sadd.s32 1, %s648_s14 }
   0x9   : > { %s26_s20 = ssub.s32 %s652_s15, %s705_s18  ;;  %p36_p0 = scmp.ne.s32.totalorder %s648_s14, %s644_s13 }
   0xa   : > { %p27_p1 = scmp.eq.s32.totalorder %s26_s20, 0  ;;  %p37_p2 = scmp.eq.s32.totalorder %s652_s15, 0 }
   0xb   : > { %p42_p3 = scmp.ne.s32.totalorder %s644_s13, %s640_s12  ;;  %p43_p4 = scmp.eq.s32.totalorder %s701_s16, 0 }
   0xc   : > { %s717_s21 = scalar_select %p27_p1, %s648_s14, %s29_s19  }
   0xd   : > { %p38_p5 = por %p37_p2, %p36_p0  ;;  %p719_p6 = por %p43_p4, %p42_p3 }
   0xe   : > { %p118_p7 = scmp.eq.s32.totalorder %s701_s16, 1  ;;  %p124_p8 = scmp.eq.s32.totalorder %s406_s17, 1 }
   0xf   : > { %s928_s22 = scalar_select %p719_p6, 1, 0 }
  0x10   : > { %p454_p10 = scmp.lt.s32.totalorder %s652_s15, 2  ;;  %p726_p11 = por %p118_p7, %p36_p0 }
  0x11   : > { %p730_p12 = por %p124_p8, %p42_p3  ;;  %s735_s25 = sand.u32 1, %s648_s14  }
  0x12   : > { %s929_s23 = scalar_select %p726_p11, 1, 0 }
  0x13   : > { %s930_s24 = scalar_select %p730_p12, 1, 0 }
  0x14   : > { %s428_s26 = sshll.u32 %s652_s15, 7  ;;  %s409_s27 = sshll.u32 %s735_s25, 3 }
  0x15   : > { %p739_p13 = pnand %p454_p10, %p38_p5  ;;  %s163_s29 = sand.u32 1, %s652_s15  }
  0x16   : > { %s749_s5 = scalar_lea.hbm %s922_s1, %s428_s26  ;;  %s167_s6 = scalar_lea.vmem [#allocation5], %s409_s27 }
  0x17   : > { %s931_s28 = scalar_select %p739_p13, 1, 0 }
  0x18   : > { %s175_s7 = sshll.u32 %s167_s6, 4  ;;  %s756_s8 = scalar_lea.sflag [#allocation6], %s163_s29  ;;  %s753_s7 = int_to_ptr.vmem [resolvable:$true] %s175_s7 }
  0x19   : > { %s492_s9 = scalar_lea.hbm %s749_s5, 128  ;;  %p762_p2 = pneg %p739_p13 }
  0x1a   : > { %p493_p1 = scmp.ne.s32.totalorder %s749_s5, %s492_s9  ;;  %s497_s19 = scalar_lea.hbm %s922_s1, 256 }
  0x1b   : > { %p498_p5 = scmp.lt.u32.totalorder %s749_s5, %s922_s1  ;;  %p499_p7 = scmp.lt.u32.totalorder %s497_s19, %s492_s9 }
  0x1c   : > { %p495_p3 = pnand %p762_p2, %p493_p1  ;;  %p501_p10 = scmp.lt.u32.totalorder %s492_s9, %s749_s5 }
  0x1d   : > { %p500_p8 = por %p499_p7, %p498_p5 }
  0x1e   : > { %p496_p4 = pneg %p495_p3 }
  0x1f   : > { %p502_p9 = por %p501_p10, %p500_p8 }
  0x21   : > { %p503_p0 = pnand %p502_p9, %p496_p4 }
  0x23   : > { %506 = shalt.err (!%p503_p0)
}
  0x24   : > { %s507_s29 = scalar_lea.vmem %s753_s7, 128  ;;  %s654_s4 = smov [#allocation5]  }
  0x25   : > { %p508_p1 = scmp.ne.s32.totalorder %s753_s7, %s507_s29  ;;  %s512_s6 = sshll.u32 %s654_s4, 4  ;;  %s513_s6 = int_to_ptr.vmem [resolvable:$false] %s512_s6 }
  0x26   : > { %s514_s11 = scalar_lea.vmem %s513_s6, 256  ;;  %p515_p11 = scmp.lt.s32.totalorder %s753_s7, %s513_s6 }
  0x27   : > { %p510_p3 = pnand %p508_p1, %p762_p2  ;;  %p516_p6 = scmp.lt.s32.totalorder %s514_s11, %s507_s29 }
  0x29   : > { %p511_p12 = pneg %p510_p3  ;;  %p517_p5 = por %p516_p6, %p515_p11 }
  0x2b   : > { %p518_p7 = pnand %p517_p5, %p511_p12 }
  0x2d   : > { %521 = shalt.err (!%p518_p7)
}
  0x2e   : > { %446 = dma.hbm_to_vmem [thread:$0]  (!%p739_p13), %s749_s5, 128, %s753_s7, %s756_s8  }
  0x2f   : > { %p199_p9 = scmp.lt.s32.totalorder %s652_s15, 3  ;;  %s792_s19 = scalar_lea.hbm %s921_s0, %s428_s26 }
  0x30   : > { %p933_p6 = scmp.ge.s32.totalorder %s652_s15, 1  ;;  %s148_s30 = scalar_lea.vmem [#allocation2], %s409_s27 }
  0x31   : > { %s156_s29 = sshll.u32 %s148_s30, 4  ;;  %s415_s5 = sshll.u32 %s735_s25, 4  ;;  %s802_s29 = int_to_ptr.vmem [resolvable:$true] %s156_s29 }
  0x32   : > { %p796_p11 = pnand %p933_p6, %p199_p9  ;;  %s145_s7 = scalar_lea.sflag [#allocation3], %s735_s25 }
  0x33   : > { %s522_s4 = scalar_lea.hbm %s792_s19, 128  ;;  %s527_s11 = scalar_lea.hbm %s921_s0, 256 }
  0x34   : > { %s934_s20 = scalar_select %p796_p11, 1, 0 }
  0x35   : > { %p523_p12 = scmp.ne.s32.totalorder %s792_s19, %s522_s4  ;;  %p528_p8 = scmp.lt.u32.totalorder %s792_s19, %s921_s0 }
  0x36   : > { %p529_p10 = scmp.lt.u32.totalorder %s527_s11, %s522_s4  ;;  %p531_p3 = scmp.lt.u32.totalorder %s522_s4, %s792_s19 }
  0x37   : > { %p525_p0 = pnand %p523_p12, %p762_p2 }
  0x38   : > { %p530_p1 = por %p529_p10, %p528_p8 }
  0x39   : > { %p526_p4 = pneg %p525_p0 }
  0x3a   : > { %p532_p5 = por %p531_p3, %p530_p1 }
  0x3c   : > { %p533_p7 = pnand %p532_p5, %p526_p4 }
  0x3e   : > { %536 = shalt.err (!%p533_p7)
}
  0x3f   : > { %s537_s27 = scalar_lea.vmem %s802_s29, 128  ;;  %s655_s30 = smov [#allocation2]  }
  0x40   : > { %p538_p9 = scmp.ne.s32.totalorder %s802_s29, %s537_s27  ;;  %s542_s26 = sshll.u32 %s655_s30, 4  ;;  %s543_s26 = int_to_ptr.vmem [resolvable:$false] %s542_s26 }
  0x41   : > { %s544_s6 = scalar_lea.vmem %s543_s26, 256  ;;  %p545_p0 = scmp.lt.s32.totalorder %s802_s29, %s543_s26 }
  0x42   : > { %p540_p6 = pnand %p538_p9, %p762_p2  ;;  %p546_p11 = scmp.lt.s32.totalorder %s544_s6, %s537_s27 }
  0x44   : > { %p541_p12 = pneg %p540_p6  ;;  %p547_p8 = por %p546_p11, %p545_p0 }
  0x46   : > { %p548_p10 = pnand %p547_p8, %p541_p12 }
  0x48   : > { %551 = shalt.err (!%p548_p10)
}
  0x49   : > { %443 = dma.hbm_to_vmem [thread:$0]  (!%p739_p13), %s792_s19, 128, %s802_s29, %s145_s7  }
  0x4a   : > { %s430_s4 = sshll.u32 %s652_s15, 8  ;;  %s186_s27 = scalar_lea.vmem [#allocation7], %s415_s5 }
  0x4b   : > { %s831_s17 = scalar_lea.hbm %s923_s2, %s430_s4  ;;  %s194_s30 = sshll.u32 %s186_s27, 4  ;;  %s195_s30 = int_to_ptr.vmem [resolvable:$true] %s194_s30 }
  0x4c   : > { %s552_s26 = scalar_lea.hbm %s831_s17, 256  ;;  %s557_s7 = scalar_lea.hbm %s923_s2, 512 }
  0x4d   : > { %p553_p11 = scmp.ne.s32.totalorder %s831_s17, %s552_s26  ;;  %p558_p3 = scmp.lt.u32.totalorder %s831_s17, %s923_s2 }
  0x4e   : > { %p559_p5 = scmp.lt.u32.totalorder %s557_s7, %s552_s26  ;;  %p561_p9 = scmp.lt.u32.totalorder %s552_s26, %s831_s17 }
  0x4f   : > { %p555_p4 = pnand %p553_p11, %p762_p2 }
  0x50   : > { %p560_p7 = por %p559_p5, %p558_p3 }
  0x51   : > { %p556_p1 = pneg %p555_p4 }
  0x52   : > { %p562_p6 = por %p561_p9, %p560_p7 }
  0x54   : > { %p563_p12 = pnand %p562_p6, %p556_p1 }
  0x56   : > { %566 = shalt.err (!%p563_p12)
}
  0x57   : > { %s567_s25 = scalar_lea.vmem %s195_s30, 256  ;;  %s656_s5 = smov [#allocation7]  }
  0x58   : > { %p568_p0 = scmp.ne.s32.totalorder %s195_s30, %s567_s25  ;;  %s572_s11 = sshll.u32 %s656_s5, 4  ;;  %s573_s11 = int_to_ptr.vmem [resolvable:$false] %s572_s11 }
  0x59   : > { %s574_s9 = scalar_lea.vmem %s573_s11, 512  ;;  %p575_p11 = scmp.lt.s32.totalorder %s195_s30, %s573_s11 }
  0x5a   : > { %p570_p8 = pnand %p568_p0, %p762_p2  ;;  %p576_p4 = scmp.lt.s32.totalorder %s574_s9, %s567_s25 }
  0x5c   : > { %p571_p10 = pneg %p570_p8  ;;  %p577_p13 = por %p576_p4, %p575_p11 }
  0x5e   : > { %p578_p3 = pnand %p577_p13, %p571_p10 }
  0x60   : > { %581 = shalt.err (!%p578_p3)
}
  0x61   : > { %p935_p5 = scmp.ne.s32.totalorder %s931_s28, 0  ;;  %p936_p1 = scmp.ne.s32.totalorder %s934_s20, 0 }
  0x62   : > { %s856_s10 = sand.u32 (!%p936_p1), 1, %s644_s13   ;;  %p937_p2 = scmp.ne.s32.totalorder (!%p936_p1), %s928_s22, 0 }
  0x63   : > { %449 = dma.hbm_to_vmem [thread:$0]  (!%p935_p5), %s831_s17, 256, %s195_s30, %s756_s8  }
  0x64   : > { %203 = sbr.rel (%p936_p1) target bundleno = 139 (0x8b), region = 32  ;;  %s419_s27 = sshll.u32 (!%p936_p1), %s856_s10, 3 }
  0x65   : > { %s206_s26 = scalar_lea.sflag (!%p936_p1), [#allocation3], %s856_s10  ;;  %s209_s19 = scalar_lea.vmem (!%p936_p1), [#allocation2], %s419_s27 }
  0x6b   : > { %627 = dma.done.wait (%p937_p2), %s206_s26, 128  }
  0x6c   : > { %629 = vsyncadd (%p937_p2), %s206_s26, 4294967168  ;;  %s214_s28 = sand.u32 1, %s701_s16   ;;  %s218_s20 = scalar_lea.vmem [#allocation5], %s419_s27 }
  0x6d   : > { %s215_s8 = scalar_lea.sflag [#allocation6], %s214_s28 }
  0x6e   : > { %631 = dma.done.wait (%p937_p2), %s215_s8, 384  }
  0x6f   : > { %633 = vsyncadd (%p937_p2), %s215_s8, 4294966912  ;;  %s422_s17 = sshll.u32 %s856_s10, 5  ;;  %s421_s30 = sshll.u32 %s856_s10, 4  ;;  %v260_v0 = vld [vmem:[%s209_s19] sm:$0xff]  ;;  %v266_v1 = vld [vmem:[%s218_s20] sm:$0xff] }
  0x70   : > { %s259_s29 = scalar_lea.vmem [#allocation8], %s422_s17  ;;  %s431_s6 = sshll.u32 %s701_s16, 9  ;;  %v262_v3 = vcombine.high %v260_v0, %v260_v0  ;;  %v268_v4 = vcombine.low %v266_v1, %v266_v1 }
  0x71   : > { %s290_s7 = sshll.u32 %s259_s29, 4  ;;  %s227_s4 = scalar_lea.vmem [#allocation7], %s421_s30  ;;  %264 = vst [vmem:[%s259_s29] sm:$0xf] %v260_v0  ;;  %271 = vst [vmem:[%s259_s29 + $0x8] sm:$0xf0] %v266_v1  ;;  %s872_s7 = int_to_ptr.vmem [resolvable:$true] %s290_s7 }
  0x72   : > { %v272_v2 = vld [vmem:[%s227_s4] sm:$0xff]  ;;  %s877_s5 = scalar_lea.hbm %s924_s3, %s431_s6  ;;  %v273_v5 = vld [vmem:[%s227_s4 + $0x8] sm:$0xff]  ;;  %265 = vst [vmem:[%s259_s29 + $0x8] sm:$0xf] %v262_v3  ;;  %270 = vst [vmem:[%s259_s29] sm:$0xf0] %v268_v4  ;;  %s277_s16 = scalar_lea.sflag [#allocation4], %s856_s10 }
  0x73   : > { %274 = vst [vmem:[%s259_s29 + $0x10] sm:$0xff] %v272_v2  ;;  %275 = vst [vmem:[%s259_s29 + $0x18] sm:$0xff] %v273_v5  ;;  %s582_s11 = scalar_lea.vmem %s872_s7, 512  ;;  %p938_p7 = scmp.ne.s32.totalorder %s929_s23, 0 }
  0x74   : > { %p583_p13 = scmp.ne.s32.totalorder %s872_s7, %s582_s11  ;;  %s657_s9 = smov [#allocation8]  }
  0x75   : > { %s586_s27 = sshll.u32 %s657_s9, 4  ;;  %s587_s27 = int_to_ptr.vmem [resolvable:$false] %s586_s27 }
  0x76   : > { %p584_p9 = pnand %p583_p13, %p938_p7  ;;  %s588_s26 = scalar_lea.vmem %s587_s27, 1024 }
  0x77   : > { %p589_p12 = scmp.lt.s32.totalorder %s872_s7, %s587_s27  ;;  %p590_p0 = scmp.lt.s32.totalorder %s588_s26, %s582_s11 }
  0x78   : > { %p585_p6 = pneg %p584_p9 }
  0x79   : > { %p591_p8 = por %p590_p0, %p589_p12 }
  0x7b   : > { %p592_p10 = pnand %p591_p8, %p585_p6 }
  0x7d   : > { %595 = shalt.err (!%p592_p10)
}
  0x7e   : > { %s596_s19 = scalar_lea.hbm %s877_s5, 512  ;;  %s600_s20 = scalar_lea.hbm %s924_s3, 1024 }
  0x7f   : > { %p597_p11 = scmp.ne.s32.totalorder %s877_s5, %s596_s19  ;;  %p601_p5 = scmp.lt.u32.totalorder %s877_s5, %s924_s3 }
  0x80   : > { %p602_p1 = scmp.lt.u32.totalorder %s600_s20, %s596_s19  ;;  %p604_p13 = scmp.lt.u32.totalorder %s596_s19, %s877_s5 }
  0x81   : > { %p598_p4 = pnand %p597_p11, %p938_p7 }
  0x82   : > { %p603_p2 = por %p602_p1, %p601_p5 }
  0x83   : > { %p599_p3 = pneg %p598_p4 }
  0x84   : > { %p605_p9 = por %p604_p13, %p603_p2 }
  0x86   : > { %p606_p6 = pnand %p605_p9, %p599_p3 }
  0x88   : > { %609 = shalt.err (!%p606_p6)
}
  0x89   : > { %s658_s29 = smov 256   ;;  %s659_s6 = smov 16  }
  0x8a   : > { %438 = dma.vmem_to_hbm [thread:$0]  (%p938_p7), %s872_s7, 512, %s877_s5, %s277_s16, %s658_s29, %s658_s29, %s659_s6  }
  0x8b PF: > { %s305_s4 = sand.u32 1, %s640_s12   ;;  %p939_p12 = scmp.ne.s32.totalorder %s930_s24, 0 }
  0x8c   : > { %p940_p0 = scmp.ge.s32.totalorder %s652_s15, 2  ;;  %s306_s22 = scalar_lea.sflag [#allocation4], %s305_s4 }
  0x8e   : > { %p451_p8 = pnand %p940_p0, %p939_p12 }
  0x90   : > { %635 = dma.done.wait (!%p451_p8), %s306_s22, 512  }
  0x91   : > { %637 = vsyncadd (!%p451_p8), %s306_s22, 4294966784  ;;  %p19_p10 = scmp.ge.s32.totalorder %s705_s18, 4   ;;  %s941_s12 = smov %s644_s13 }
  0x92   : > { %s942_s13 = smov %s648_s14  ;;  %s943_s14 = smov %s717_s21 }
  0x93   : > { %s944_s15 = smov %s705_s18  ;;  %21 = sbr.rel (!%p19_p10) target bundleno = 7 (0x7), region = 101 }
  0x9a   :  { %311 = vsyncpa [#allocation3], 1 }
  0x9b   :  { %313 = vsyncpa [#allocation3 + $0x1], 1 }
  0x9c   :  { %314 = vsyncpa [#allocation6], 1 }
  0x9d   :  { %316 = vsyncpa [#allocation6 + $0x1], 1 }
  0x9e   :  { %317 = vsyncpa [#allocation4], 1 }
  0x9f   :  { %319 = vsyncpa [#allocation4 + $0x1], 1 }

</bundles_post_ra>
